<compile_context>
chip_gen: v5e
topology: v5e:2x2
jax: 0.10.0
libtpu: 0.0.40
codegen_flags: <defaults>
</compile_context>

<pallas_src>
import jax
import jax.numpy as jnp
from jax.experimental import pallas as pl
from jax.experimental.pallas import tpu as pltpu

_MAX_INFLIGHT_DMAS = 4         # overlap up to 4 in-flight HBM->HBM transfers
_MIN_CHUNK_BYTES = 1 << 20     # don't bother splitting below ~1 MiB per chunk


def _plan_chunks(shape, dtype):
    """Static (lo, size) chunks along dim 0, or (None,) for a single full copy."""
    if len(shape) == 0:
        return (None,)
    rows = int(shape[0])
    total = 1
    for s in shape:
        total *= int(s)
    total_bytes = total * jnp.dtype(dtype).itemsize
    if rows <= 1 or total_bytes < 2 * _MIN_CHUNK_BYTES:
        return (None,)
    n = int(min(_MAX_INFLIGHT_DMAS, rows, total_bytes // _MIN_CHUNK_BYTES))
    base, rem = divmod(rows, n)
    bounds, start = [], 0
    for c in range(n):
        size = base + (1 if c < rem else 0)
        bounds.append((start, size))
        start += size
    return tuple(bounds)


def _make_dma_copy_kernel(chunks):
    """HBM->HBM copy: start every chunk's DMA, then wait on all of them."""
    def kernel(x_hbm, o_hbm, sems):
        copies = []
        for c, bounds in enumerate(chunks):
            if bounds is None:
                src, dst = x_hbm, o_hbm
            else:
                lo, size = bounds                      # static Python ints
                src = x_hbm.at[pl.ds(lo, size)]
                dst = o_hbm.at[pl.ds(lo, size)]
            cp = pltpu.make_async_copy(src, dst, sems.at[c])
            cp.start()
            copies.append(cp)
        for cp in copies:
            cp.wait()
    return kernel


def dummy_rms_forward(x, *, epsilon=1e-5, unnorm=False):
    """Pallas implementation of DummyRMS.forward, materialized into a new buffer.

    epsilon / unnorm are accepted for API parity but unused, exactly like the
    reference module.  For the hot path prefer DummyRMSPallas.__call__, which
    returns the input directly (zero HBM traffic).
    """
    del epsilon, unnorm
    if x.ndim == 0 or x.size == 0:
        return x  # nothing worth a DMA

    chunks = _plan_chunks(x.shape, x.dtype)
    nbytes = x.size * jnp.dtype(x.dtype).itemsize

    return pl.pallas_call(
        _make_dma_copy_kernel(chunks),
        out_shape=jax.ShapeDtypeStruct(x.shape, x.dtype),
        in_specs=[pl.BlockSpec(memory_space=pl.ANY)],   # raw HBM ref, no auto-DMA
        out_specs=pl.BlockSpec(memory_space=pl.ANY),    # raw HBM ref, no auto-DMA
        scratch_shapes=[pltpu.SemaphoreType.DMA((len(chunks),))],
        cost_estimate=pl.CostEstimate(
            flops=0, transcendentals=0, bytes_accessed=2 * int(nbytes)),
    )(x)


class DummyRMSPallas:
    """Mirror of the PyTorch DummyRMS module (no learnable parameters)."""

    def __init__(self, insize, epsilon=1e-5, per_channel=False, norm_only=False):
        print("DummyRMS: ", insize)
        self.insize = insize
        self.epsilon = epsilon

    def __call__(self, x, unnorm=False, materialize=False):
        # Hot path: forward is a pure identity -> skip the kernel entirely.
        if not materialize:
            return x
        # Optional path producing a fresh buffer via a DMA-engine copy.
        return dummy_rms_forward(x, epsilon=self.epsilon, unnorm=unnorm)

    def update(self, x):
        return None


if __name__ == "__main__":
    key = jax.random.PRNGKey(0)
    k1, k2, k3 = jax.random.split(key, 3)

    batch, insize = 8, 32
    x = jax.random.normal(k1, (batch, insize), dtype=jnp.float32)

    mod = DummyRMSPallas(insize)

    # 1) Hot path: pure identity, zero kernel launch / zero HBM traffic.
    y_fast = mod(x)
    assert y_fast is x  # eager-mode only; under jit the identity is a traced value

    # 2) Materialize path, single in-flight DMA (small array).
    y = jax.block_until_ready(mod(x, materialize=True))
    assert y.shape == x.shape and y.dtype == x.dtype
    assert bool(jnp.array_equal(y, x)), "identity forward mismatch (small)"

    # 3) Materialize path, chunked overlapping DMAs (>= 2 MiB array -> 2 chunks).
    xb = jax.random.normal(k2, (512, 1024), dtype=jnp.float32)
    yb = jax.block_until_ready(dummy_rms_forward(xb))
    assert bool(jnp.array_equal(yb, xb)), "identity forward mismatch (chunked)"

    # 4) Non-128-multiple trailing dim: fine on the DMA path (no vector stores).
    xo = jax.random.normal(k3, (2, 4, 16, 16), dtype=jnp.bfloat16)
    yo = jax.block_until_ready(dummy_rms_forward(xo))
    assert bool(jnp.array_equal(yo, xo)), "identity forward mismatch (odd shape)"

    assert mod.update(x) is None
    print("KERNEL_OK")
</pallas_src>

<mosaic_0001>
module attributes {stable_mosaic.version = 11 : i64} {
  func.func @kernel(%arg0: memref<8x32xf32, #tpu.memory_space<any>>, %arg1: memref<8x32xf32, #tpu.memory_space<any>>, %arg2: memref<1x!tpu.dma_semaphore, #tpu.memory_space<semaphore_mem>>) attributes {dimension_semantics = [], scalar_prefetch = 0 : i64, scratch_operands = 1 : i64, tpu.core_type = #tpu.core_type<tc>} {
    %c0_i32 = arith.constant 0 : i32
    %0 = tpu.memref_slice %arg2[%c0_i32] : memref<1x!tpu.dma_semaphore, #tpu.memory_space<semaphore_mem>> -> memref<1x!tpu.dma_semaphore, #tpu.memory_space<semaphore_mem>>
    %1 = tpu.memref_squeeze %0 : memref<1x!tpu.dma_semaphore, #tpu.memory_space<semaphore_mem>> -> memref<!tpu.dma_semaphore, #tpu.memory_space<semaphore_mem>>
    tpu.enqueue_dma source(%arg0 : memref<8x32xf32, #tpu.memory_space<any>>) target(%arg1 : memref<8x32xf32, #tpu.memory_space<any>>) target_semaphore(%1 : memref<!tpu.dma_semaphore, #tpu.memory_space<semaphore_mem>>)
    %c0_i32_0 = arith.constant 0 : i32
    %2 = tpu.memref_slice %arg2[%c0_i32_0] : memref<1x!tpu.dma_semaphore, #tpu.memory_space<semaphore_mem>> -> memref<1x!tpu.dma_semaphore, #tpu.memory_space<semaphore_mem>>
    %3 = tpu.memref_squeeze %2 : memref<1x!tpu.dma_semaphore, #tpu.memory_space<semaphore_mem>> -> memref<!tpu.dma_semaphore, #tpu.memory_space<semaphore_mem>>
    tpu.wait_dma2 semaphore(%3 : memref<!tpu.dma_semaphore, #tpu.memory_space<semaphore_mem>>) src(%arg0 : memref<8x32xf32, #tpu.memory_space<any>>) dst(%arg1 : memref<8x32xf32, #tpu.memory_space<any>>)
    return
  }
}

</mosaic_0001>

<bundles_post_ra>
// kernel: tpu_custom_call.1
= control target key start
LH: loop header
LB: loop body
LE: loop exit
PB: predicated region body
PF: predicated region fallthrough
CT: control target
= control target key end

     0   :  { %s32_s12 = smov [#allocation2]   ;;  %s33_s13 = smov [#allocation3]   ;;  %s51_s0 = inlined_call_operand.hbm [shape: f32[8,32], index: 0, kind: input, shape index: {}]   ;;  %s52_s1 = inlined_call_operand.hbm [shape: f32[8,32], index: 1, kind: output, shape index: {}]  }
   0x1   :  { %s10_s8 = sshll.u32 %s51_s0, 4  ;;  %s12_s11 = sshll.u32 %s52_s1, 4  ;;  %s11_s8 = int_to_ptr.hbm [resolvable:$true] %s10_s8  ;;  %s13_s11 = int_to_ptr.hbm [resolvable:$true] %s12_s11 }
   0x2   :  { %s34_s14 = smov 0  }
   0x3   :  { %16 = dma.general %s11_s8, 128, %s13_s11, %s32_s12, %s33_s13, [#allocation4], %s34_s14, 0  }
   0x4   :  { %30 = dma.done.wait [#allocation2], 128 }
   0x5   :  { %31 = vsyncadd [#allocation2], 4294967168 }
   0x6   :  { %20 = vsyncmov [#allocation2] }
   0x9   :  { %s21_s15 = vpop.sfrf %20 }
   0xa   :  { %p26_p0 = scmp.ne.s32.totalorder %s21_s15, 0 }
   0xc   :  { %25 = shalt.err (%p26_p0)  }

</bundles_post_ra>
